<compile_context>
chip_gen: v7x
topology: tpu7x:2x2x1
jax: 0.10.0
libtpu: 0.0.40
codegen_flags: <defaults>
</compile_context>

<pallas_src>
import jax
import jax.numpy as jnp
from jax.experimental import pallas as pl
from jax.experimental.pallas import tpu as pltpu

# Real layer widths of the PyTorch module.
IN_F, H1_F, H2_F, OUT_F = 8, 25, 10, 1

# Padded (8,128)-friendly shapes.
PAD = 128                     # lane width for every layer's output
K1, K2, K3 = 8, 32, 16        # padded contraction dims of the 3 layers
W1_OFF, W2_OFF, W3_OFF = 0, K1, K1 + K2          # 0, 8, 40
W_ROWS = K1 + K2 + K3                            # 56  (multiple of 8)
MAX_TB = 512                  # max batch rows per grid step


def _round_up(x, m):
    return ((x + m - 1) // m) * m


# ----------------------------------------------------------------------------
# Faithful re-implementation of the helper from the PyTorch source.
# NOTE: `increase & x > 0` parses as `(increase & x) > 0` == (1 & 4) > 0
#       == False, so the loop never runs and the result is always 0.0.
#       Preserved exactly (and this makes the function trace-safe: the traced
#       price_list is never indexed).
# ----------------------------------------------------------------------------
def always_increase(price_list):
    ret = 0.0
    increase = True
    x = 4
    while (increase & x) > 0:            # never true (precedence bug preserved)
        if price_list[x] >= price_list[x - 1]:
            ret += 0.25
        else:
            increase = False
    return ret


# ----------------------------------------------------------------------------
# Pallas kernel: fused 3-layer MLP on one (TB, PAD) tile of samples.
#   x_ref : (TB, 128)   activations, real features in lanes 0..7
#   w_ref : (56, 128)   stacked weights  [W1 | W2 | W3] along sublanes
#   b_ref : (8, 128)    stacked biases   rows 0/1/2 = b1/b2/b3
#   o_ref : (TB, 128)   real output in lane 0
# Zero padding is exact everywhere (padded lanes stay 0 through the ReLUs).
# ----------------------------------------------------------------------------
def ted_mlp_kernel(x_ref, w_ref, b_ref, o_ref):
    x = x_ref[...]
    w = w_ref[...]
    b = b_ref[...]

    h1 = jnp.dot(x[:, :K1], w[W1_OFF:W1_OFF + K1, :],
                 preferred_element_type=jnp.float32) + b[0:1, :]
    h1 = jnp.maximum(h1, 0.0)

    h2 = jnp.dot(h1[:, :K2], w[W2_OFF:W2_OFF + K2, :],
                 preferred_element_type=jnp.float32) + b[1:2, :]
    h2 = jnp.maximum(h2, 0.0)

    o_ref[...] = jnp.dot(h2[:, :K3], w[W3_OFF:W3_OFF + K3, :],
                         preferred_element_type=jnp.float32) + b[2:3, :]


def ted_mlp_pallas(stats, padded_params):
    """stats: (B, 8) f32 feature vectors. Returns (B, 1) f32."""
    w_stack, b_stack = padded_params
    B = stats.shape[0]

    # Adaptive batch tile: one grid step for small batches, capped for huge ones.
    tb = min(MAX_TB, _round_up(B, 8))
    b_pad = _round_up(B, tb)

    x_p = jnp.zeros((b_pad, PAD), jnp.float32).at[:B, :IN_F].set(
        stats.astype(jnp.float32))

    out = pl.pallas_call(
        ted_mlp_kernel,
        out_shape=jax.ShapeDtypeStruct((b_pad, PAD), jnp.float32),
        grid=(b_pad // tb,),
        in_specs=[
            pl.BlockSpec((tb, PAD), lambda i: (i, 0)),       # x tile per step
            pl.BlockSpec((W_ROWS, PAD), lambda i: (0, 0)),   # weights resident
            pl.BlockSpec((8, PAD), lambda i: (0, 0)),        # biases resident
        ],
        out_specs=pl.BlockSpec((tb, PAD), lambda i: (i, 0)),
        compiler_params=pltpu.CompilerParams(
            dimension_semantics=("parallel",)),
    )(x_p, w_stack, b_stack)

    return out[:B, :OUT_F]


# ----------------------------------------------------------------------------
# One-time weight packing (hoisted out of the per-inference path).
# ----------------------------------------------------------------------------
def prepare_params(params):
    w1, b1, w2, b2, w3, b3 = params
    w_stack = jnp.zeros((W_ROWS, PAD), jnp.float32)
    w_stack = w_stack.at[W1_OFF:W1_OFF + IN_F, :H1_F].set(w1.T.astype(jnp.float32))
    w_stack = w_stack.at[W2_OFF:W2_OFF + H1_F, :H2_F].set(w2.T.astype(jnp.float32))
    w_stack = w_stack.at[W3_OFF:W3_OFF + H2_F, :OUT_F].set(w3.T.astype(jnp.float32))

    b_stack = jnp.zeros((8, PAD), jnp.float32)
    b_stack = b_stack.at[0, :H1_F].set(b1.astype(jnp.float32))
    b_stack = b_stack.at[1, :H2_F].set(b2.astype(jnp.float32))
    b_stack = b_stack.at[2, :OUT_F].set(b3.astype(jnp.float32))

    return jax.device_put(w_stack), jax.device_put(b_stack)


# ----------------------------------------------------------------------------
# Feature extraction — mirrors Ted.forward, fully on-device / jit-able.
# ----------------------------------------------------------------------------
class InputMinute:
    def __init__(self, minute_list, operation_list, average, valoration):
        self.minute_list = minute_list
        self.operation_list = operation_list
        self.average = average
        self.valoration = valoration


def build_stats(minute_list, operation_list, average):
    m = minute_list.astype(jnp.float32)
    op = operation_list.astype(jnp.float32)
    avg = jnp.asarray(average, jnp.float32)
    one = jnp.float32(1.0)
    zero = jnp.float32(0.0)
    return jnp.stack([
        jnp.where(m[4] > avg, one, zero),
        jnp.where(m[4] > m[0], one, zero),
        jnp.where(m[4] > m[1], one, zero),
        jnp.where(m[4] > m[2], one, zero),
        jnp.where(m[4] > m[3], one, zero),
        jnp.float32(always_increase(m)),        # constant 0.0 (bug preserved)
        jnp.where(op[4] > op[5], one, zero),
        jnp.float32(always_increase(op[:5])),   # constant 0.0 (bug preserved)
    ])


@jax.jit
def _ted_forward_jit(minute_list, operation_list, average, padded_params):
    stats = build_stats(minute_list, operation_list, average)       # (8,)
    return ted_mlp_pallas(stats[None, :], padded_params)[0]         # (1,)


def ted_forward(input_minute, padded_params):
    return _ted_forward_jit(input_minute.minute_list,
                            input_minute.operation_list,
                            jnp.asarray(input_minute.average, jnp.float32),
                            padded_params)


ted_mlp_batched = jax.jit(ted_mlp_pallas)


# ----------------------------------------------------------------------------
# Deterministic parameter init (PyTorch Linear default: U(-1/sqrt(in), 1/sqrt(in)))
# ----------------------------------------------------------------------------
def init_params(key):
    def linear(key, out_f, in_f):
        kw, kb = jax.random.split(key)
        bound = 1.0 / jnp.sqrt(in_f)
        w = jax.random.uniform(kw, (out_f, in_f), jnp.float32, -bound, bound)
        b = jax.random.uniform(kb, (out_f,), jnp.float32, -bound, bound)
        return w, b

    k1, k2, k3 = jax.random.split(key, 3)
    w1, b1 = linear(k1, H1_F, IN_F)
    w2, b2 = linear(k2, H2_F, H1_F)
    w3, b3 = linear(k3, OUT_F, H2_F)
    return (w1, b1, w2, b2, w3, b3)


if __name__ == "__main__":
    key = jax.random.PRNGKey(0)
    k_params, k_min, k_op, k_batch = jax.random.split(key, 4)

    params = init_params(k_params)
    padded_params = prepare_params(params)      # padded/stacked once, reused

    minute_list = jax.random.uniform(k_min, (5,), jnp.float32, 0.0, 10.0)
    operation_list = jax.random.uniform(k_op, (6,), jnp.float32, 0.0, 10.0)
    average = jnp.mean(minute_list)
    input_minute = InputMinute(minute_list, operation_list, average, valoration=1.0)

    # Single-sample forward (matches PyTorch Ted.forward).
    out = jax.block_until_ready(ted_forward(input_minute, padded_params))

    # Pure-JAX reference of the MLP.
    w1, b1, w2, b2, w3, b3 = params

    def ref_mlp(s):
        h = jnp.maximum(s @ w1.T + b1, 0.0)
        h = jnp.maximum(h @ w2.T + b2, 0.0)
        return h @ w3.T + b3

    stats = build_stats(minute_list, operation_list, average)
    ref = ref_mlp(stats)
    assert jnp.allclose(out, ref, atol=1e-5), (out, ref)

    # Batched path #1: 16 samples -> single 16-row tile (adaptive TB).
    stats_batch = jax.random.uniform(k_batch, (16, IN_F), jnp.float32, 0.0, 1.0)
    out_b = jax.block_until_ready(ted_mlp_batched(stats_batch, padded_params))
    ref_b = jax.vmap(ref_mlp)(stats_batch)
    assert jnp.allclose(out_b, ref_b, atol=1e-5), (out_b, ref_b)

    # Batched path #2: ragged batch (13 samples) exercises zero-padded rows.
    stats_rag = jax.random.uniform(jax.random.PRNGKey(7), (13, IN_F),
                                   jnp.float32, -1.0, 1.0)
    out_r = jax.block_until_ready(ted_mlp_batched(stats_rag, padded_params))
    ref_r = jax.vmap(ref_mlp)(stats_rag)
    assert jnp.allclose(out_r, ref_r, atol=1e-5), (out_r, ref_r)

    print("KERNEL_OK")
</pallas_src>

<mosaic_0001>
module attributes {stable_mosaic.version = 11 : i64} {
  func.func @ted_mlp_kernel(%arg0: i32, %arg1: memref<8x128xf32, #tpu.memory_space<vmem>>, %arg2: memref<56x128xf32, #tpu.memory_space<vmem>>, %arg3: memref<8x128xf32, #tpu.memory_space<vmem>>, %arg4: memref<8x128xf32, #tpu.memory_space<vmem>>) attributes {dimension_semantics = [#tpu.dimension_semantics<parallel>], iteration_bounds = array<i64: 1>, scalar_prefetch = 0 : i64, scratch_operands = 0 : i64, tpu.core_type = #tpu.core_type<tc>, window_params = [{transform_indices = @transform_0, window_bounds = array<i64: 8, 128>}, {pipeline_mode = #tpu.pipeline_mode<synchronous>, transform_indices = @transform_1, window_bounds = array<i64: 56, 128>}, {pipeline_mode = #tpu.pipeline_mode<synchronous>, transform_indices = @transform_2, window_bounds = array<i64: 8, 128>}, {transform_indices = @transform_3, window_bounds = array<i64: 8, 128>}]} {
    %c0 = arith.constant 0 : index
    %c0_0 = arith.constant 0 : index
    %0 = vector.load %arg1[%c0, %c0_0] : memref<8x128xf32, #tpu.memory_space<vmem>>, vector<8x128xf32>
    %c0_1 = arith.constant 0 : index
    %c0_2 = arith.constant 0 : index
    %1 = vector.load %arg2[%c0_1, %c0_2] : memref<56x128xf32, #tpu.memory_space<vmem>>, vector<56x128xf32>
    %c0_3 = arith.constant 0 : index
    %c0_4 = arith.constant 0 : index
    %2 = vector.load %arg3[%c0_3, %c0_4] : memref<8x128xf32, #tpu.memory_space<vmem>>, vector<8x128xf32>
    %3 = vector.extract_strided_slice %0 {offsets = [0, 0], sizes = [8, 8], strides = [1, 1]} : vector<8x128xf32> to vector<8x8xf32>
    %4 = vector.extract_strided_slice %1 {offsets = [0, 0], sizes = [8, 128], strides = [1, 1]} : vector<56x128xf32> to vector<8x128xf32>
    %cst = arith.constant dense<0.000000e+00> : vector<8x128xf32>
    %5 = tpu.matmul %3, %4, %cst {dimension_numbers = #tpu.dot_dimension_numbers<[1], [0], [0], [1], [0, 0, 1, 1], [], []>} : vector<8x8xf32>, vector<8x128xf32>, vector<8x128xf32> -> vector<8x128xf32>
    %6 = vector.extract_strided_slice %2 {offsets = [0, 0], sizes = [1, 128], strides = [1, 1]} : vector<8x128xf32> to vector<1x128xf32>
    %7 = vector.broadcast %6 : vector<1x128xf32> to vector<8x128xf32>
    %8 = arith.addf %5, %7 : vector<8x128xf32>
    %cst_5 = arith.constant 0.000000e+00 : f32
    %9 = vector.broadcast %cst_5 : f32 to vector<8x128xf32>
    %10 = arith.maximumf %8, %9 : vector<8x128xf32>
    %11 = vector.extract_strided_slice %10 {offsets = [0, 0], sizes = [8, 32], strides = [1, 1]} : vector<8x128xf32> to vector<8x32xf32>
    %12 = vector.extract_strided_slice %1 {offsets = [8, 0], sizes = [32, 128], strides = [1, 1]} : vector<56x128xf32> to vector<32x128xf32>
    %cst_6 = arith.constant dense<0.000000e+00> : vector<8x128xf32>
    %13 = tpu.matmul %11, %12, %cst_6 {dimension_numbers = #tpu.dot_dimension_numbers<[1], [0], [0], [1], [0, 0, 1, 1], [], []>} : vector<8x32xf32>, vector<32x128xf32>, vector<8x128xf32> -> vector<8x128xf32>
    %14 = vector.extract_strided_slice %2 {offsets = [1, 0], sizes = [1, 128], strides = [1, 1]} : vector<8x128xf32> to vector<1x128xf32>
    %15 = vector.broadcast %14 : vector<1x128xf32> to vector<8x128xf32>
    %16 = arith.addf %13, %15 : vector<8x128xf32>
    %cst_7 = arith.constant 0.000000e+00 : f32
    %17 = vector.broadcast %cst_7 : f32 to vector<8x128xf32>
    %18 = arith.maximumf %16, %17 : vector<8x128xf32>
    %19 = vector.extract_strided_slice %18 {offsets = [0, 0], sizes = [8, 16], strides = [1, 1]} : vector<8x128xf32> to vector<8x16xf32>
    %20 = vector.extract_strided_slice %1 {offsets = [40, 0], sizes = [16, 128], strides = [1, 1]} : vector<56x128xf32> to vector<16x128xf32>
    %cst_8 = arith.constant dense<0.000000e+00> : vector<8x128xf32>
    %21 = tpu.matmul %19, %20, %cst_8 {dimension_numbers = #tpu.dot_dimension_numbers<[1], [0], [0], [1], [0, 0, 1, 1], [], []>} : vector<8x16xf32>, vector<16x128xf32>, vector<8x128xf32> -> vector<8x128xf32>
    %22 = vector.extract_strided_slice %2 {offsets = [2, 0], sizes = [1, 128], strides = [1, 1]} : vector<8x128xf32> to vector<1x128xf32>
    %23 = vector.broadcast %22 : vector<1x128xf32> to vector<8x128xf32>
    %24 = arith.addf %21, %23 : vector<8x128xf32>
    %c0_9 = arith.constant 0 : index
    %c0_10 = arith.constant 0 : index
    %25 = vector.load %arg4[%c0_9, %c0_10] : memref<8x128xf32, #tpu.memory_space<vmem>>, vector<8x128xf32>
    tpu.vector_store %arg4[%c0_9, %c0_10], %24 {strides = array<i32>} : memref<8x128xf32, #tpu.memory_space<vmem>>, vector<8x128xf32>,
    return
  }
  func.func @transform_0(%arg0: i32) -> (i32, i32) {
    %c0_i32 = arith.constant 0 : i32
    %c0_i32_0 = arith.constant 0 : i32
    return %arg0, %c0_i32 : i32, i32
  }
  func.func @transform_1(%arg0: i32) -> (i32, i32) {
    %c0_i32 = arith.constant 0 : i32
    %c0_i32_0 = arith.constant 0 : i32
    %c0_i32_1 = arith.constant 0 : i32
    return %c0_i32, %c0_i32_0 : i32, i32
  }
  func.func @transform_2(%arg0: i32) -> (i32, i32) {
    %c0_i32 = arith.constant 0 : i32
    %c0_i32_0 = arith.constant 0 : i32
    %c0_i32_1 = arith.constant 0 : i32
    return %c0_i32, %c0_i32_0 : i32, i32
  }
  func.func @transform_3(%arg0: i32) -> (i32, i32) {
    %c0_i32 = arith.constant 0 : i32
    %c0_i32_0 = arith.constant 0 : i32
    return %arg0, %c0_i32 : i32, i32
  }
}

</mosaic_0001>

<bundles_post_ra>
// kernel: _ted_forward_jit.1
= control target key start
LH: loop header
LB: loop body
LE: loop exit
PB: predicated region body
PF: predicated region fallthrough
CT: control target
= control target key end

     0   :  { %vm27_vm0 = vcmask 64512   ;;  %v312_v0 = vmov 0.0   ;;  %vm313_vm1 = vmmov 0   ;;  %v314_v4 = vmov 0.0|0.0   ;;  %s365_s1 = inlined_call_operand.vmem [shape: f32[56,128], index: 1, kind: input, shape index: {}]   ;;  %s366_s0 = inlined_call_operand.vmem [shape: f32[8,128], index: 0, kind: input, shape index: {}]   ;;  %s367_s2 = inlined_call_operand.vmem [shape: f32[8,128], index: 2, kind: input, shape index: {}]   ;;  %s368_s3 = inlined_call_operand.vmem [shape: f32[8,128], index: 3, kind: output, shape index: {}]  }
   0x1   :  { %277 = vmatprep.subr.mxu0 %v312_v0  ;;  %v15_v1 = vld [vmem:[%s365_s1] sm:$0xff]  ;;  %279 = vmatprep.mubr.msk.f32.mxu0 %vm313_vm1, %v312_v0  ;;  %v16_v3 = vld [vmem:[%s365_s1 + $0x8] sm:$0xff]  ;;  %v17_v5 = vld [vmem:[%s365_s1 + $0x10] sm:$0xff]  ;;  %v23_v10 = vlaneseq  ;;  %vm106_vm2 = vcmask 261120   ;;  %vm185_vm3 = vcmask 130048  }
   0x2   :  { %v14_v2 = vld [vmem:[%s366_s0] sm:$0xff]  ;;  %278 = vmatpush3.msra.mxu0 %v15_v1  ;;  %300 = vmatprep.subr.bf16.mxu1 %v314_v4  ;;  %v301_v6 = vpack.c.bf16 %v17_v5, %v16_v3  ;;  %v18_v7 = vld [vmem:[%s365_s1 + $0x18] sm:$0xff]  ;;  %v20_v19 = vld [vmem:[%s365_s1 + $0x28] sm:$0xff] }
   0x3   :  { %280 = vmatmul.mubr.msk.f32.vlgmr.msra.gmra.mrb[0].mxu0 %vm27_vm0, %v14_v2  ;;  %290 = vmatprep.mubr.msk.f32.mxu1 %vm313_vm1, %v312_v0  ;;  %v19_v8 = vld [vmem:[%s365_s1 + $0x20] sm:$0xff]  ;;  %v24_v11 = vshrl.u32 %v23_v10, 7  ;;  %v21_v20 = vld [vmem:[%s365_s1 + $0x30] sm:$0xff] }
   0x4   :  { %306 = vmatprep.subr.bf16.mxu0 %v314_v4  ;;  %297 = vmatprep.mubr.msk.f32.mxu0 %vm313_vm1, %v312_v0  ;;  %v304_v9 = vpack.c.bf16 %v19_v8, %v18_v7  ;;  %v22_v13 = vld [vmem:[%s367_s2] sm:$0xff]  ;;  %v307_v21 = vpack.c.bf16 %v21_v20, %v20_v19 }
   0x5   :  { %302 = vmatpush3.bf16.msra.mxu1 %v301_v6  ;;  %v25_v12 = vsub.s32 0, %v24_v11  ;;  %v104_v22 = vsub.s32 1, %v24_v11  ;;  %v183_v28 = vsub.s32 2, %v24_v11 }
   0x6   :  { %303 = vmatprep.subr.bf16.mxu1 %v314_v4  ;;  %308 = vmatpush3.bf16.msra.mxu0 %v307_v21 }
   0x7   :  { %v26_v14 = vrot.slane %v22_v13, %v25_v12  ;;  %v105_v23 = vrot.slane %v22_v13, %v104_v22  ;;  %v184_v29 = vrot.slane %v22_v13, %v183_v28 }
   0x9   :  { %305 = vmatpush3.bf16.msra.mxu1 %v304_v9 }
  0xd6   :  { %v97_v15 = vpop.f32.mrb[0].mxu0 }
  0xd7   :  { %v98_v16 = vadd.f32 %v97_v15, %v26_v14  ;;  %v281_v17 = vpop.f32.mrb[1].mxu0 }
  0xd9   :  { %v101_v18 = vmax.f32 %v98_v16, 0.0 }
  0xdb   :  { %291 = vmatmul.mubr.msk.f32.vlgmr.msra.gmra.mrb[0].mxu1 %vm106_vm2, %v101_v18 }
 0x1ae   :  { %v176_v24 = vpop.f32.mrb[0].mxu1 }
 0x1af   :  { %v177_v25 = vadd.f32 %v176_v24, %v105_v23  ;;  %v292_v26 = vpop.f32.mrb[1].mxu1 }
 0x1b1   :  { %v180_v27 = vmax.f32 %v177_v25, 0.0 }
 0x1b3   :  { %298 = vmatmul.mubr.msk.f32.vlgmr.msra.gmra.mrb[2].mxu0 %vm185_vm3, %v180_v27 }
 0x286   :  { %v255_v30 = vpop.f32.mrb[2].mxu0 }
 0x287   :  { %v256_v31 = vadd.f32 %v255_v30, %v184_v29  ;;  %v299_v32 = vpop.f32.mrb[3].mxu0 }
 0x289   :  { %259 = vst [vmem:[%s368_s3] sm:$0xff] %v256_v31 }

</bundles_post_ra>
